<compile_context>
chip_gen: v7x
topology: tpu7x:2x2x1
jax: 0.10.0
libtpu: 0.0.40
codegen_flags: <defaults>
</compile_context>

<pallas_src>
import jax
import jax.numpy as jnp
from jax.experimental import pallas as pl
from jax.experimental.pallas import tpu as pltpu


def _trigger_kernel(img_ref, trig_ref, lb_ref, ub_ref, out_ref):
    # img_ref / trig_ref / out_ref: (C, chunk)   (leading size-1 batch dim squeezed)
    # lb_ref / ub_ref:              (C, 1)       per-channel clamp constants
    x = img_ref[...] + trig_ref[...]
    x = jnp.maximum(x, lb_ref[...])   # (C, 1) broadcasts along the lane axis
    x = jnp.minimum(x, ub_ref[...])
    out_ref[...] = x


def _pick_lane_chunk(hw: int, max_chunk: int = 32768) -> int:
    """Pick a lane-dense spatial chunk: the full H*W if it is small enough,
    otherwise the largest multiple of 128 that divides H*W and fits the VMEM
    budget (fallback: 4096 with a masked ragged tail)."""
    if hw <= max_chunk:
        return hw
    for c in range(max_chunk, 127, -128):
        if hw % c == 0:
            return c
    return 4096


def trigger_forward(image, trigger, lower_bound, upper_bound):
    """image: (B, C, H, W); trigger/lower/upper: (1, C, H, W). Returns (B, C, H, W).

    NOTE: lower_bound / upper_bound are assumed spatially constant per channel,
    which holds by construction in Trigger.__init__ ((0-mean)/std, (1-mean)/std).
    If bounds ever vary spatially, keep the full-tensor path instead.
    """
    B, C, H, W = image.shape
    HW = H * W

    img2 = image.reshape(B, C, HW)
    trig2 = trigger.reshape(C, HW)
    # Per-channel clamp constants (spatially constant by construction).
    lb_c = lower_bound.reshape(C, HW)[:, :1]   # (C, 1)
    ub_c = upper_bound.reshape(C, HW)[:, :1]   # (C, 1)

    chunk = _pick_lane_chunk(HW)
    num_chunks = pl.cdiv(HW, chunk)

    out = pl.pallas_call(
        _trigger_kernel,
        out_shape=jax.ShapeDtypeStruct((B, C, HW), image.dtype),
        grid_spec=pltpu.PrefetchScalarGridSpec(
            num_scalar_prefetch=0,
            grid=(num_chunks, B),  # batch innermost -> trigger DMA elided across batch
            in_specs=[
                pl.BlockSpec((None, C, chunk), lambda j, b: (b, 0, j)),  # image
                pl.BlockSpec((C, chunk), lambda j, b: (0, j)),           # trigger (batch-broadcast)
                pl.BlockSpec((C, 1), lambda j, b: (0, 0)),               # lower bound (per channel)
                pl.BlockSpec((C, 1), lambda j, b: (0, 0)),               # upper bound (per channel)
            ],
            out_specs=pl.BlockSpec((None, C, chunk), lambda j, b: (b, 0, j)),
        ),
        compiler_params=pltpu.CompilerParams(
            dimension_semantics=("parallel", "parallel"),
            vmem_limit_bytes=32 * 1024 * 1024,
        ),
    )(img2, trig2, lb_c, ub_c)

    return out.reshape(B, C, H, W)


def make_trigger_params(H, W, eps_255, pixel_mean, pixel_std, key, dtype=jnp.float32):
    """Replicates Trigger.__init__ (deterministic, no checkpoint)."""
    mean = jnp.asarray(pixel_mean, dtype=dtype).reshape(-1, 1, 1)   # (3,1,1)
    std = jnp.asarray(pixel_std, dtype=dtype).reshape(-1, 1, 1)     # (3,1,1)

    lower_bound = (jnp.zeros((1, 3, H, W), dtype=dtype) - mean) / std
    upper_bound = (jnp.ones((1, 3, H, W), dtype=dtype) - mean) / std

    eps = eps_255 / 255.0
    # torch.rand -> uniform in [0, 1)
    u = jax.random.uniform(key, (1, 3, H, W), dtype=dtype)
    trigger = (u - 0.5) * 2.0 * eps / std

    return trigger, lower_bound, upper_bound


if __name__ == "__main__":
    key = jax.random.PRNGKey(0)
    k_img0, k_img1, k_trig = jax.random.split(key, 3)

    # Typical cfg.INPUT.PIXEL_MEAN / PIXEL_STD (ImageNet, 0-1 scale) and EPS.
    pixel_mean = [0.485, 0.456, 0.406]
    pixel_std = [0.229, 0.224, 0.225]
    eps_255 = 8.0
    dtype = jnp.float32

    def run_case(k_img, B, C, H, W):
        trigger, lower_bound, upper_bound = make_trigger_params(
            H, W, eps_255, pixel_mean, pixel_std, k_trig, dtype=dtype
        )
        # "image" is already normalized (clamped against the normalized bounds).
        image = jax.random.normal(k_img, (B, C, H, W), dtype=dtype)

        out = trigger_forward(image, trigger, lower_bound, upper_bound)
        out = jax.block_until_ready(out)

        # Reference (pure JAX) check of the same semantics.
        ref = jnp.minimum(jnp.maximum(image + trigger, lower_bound), upper_bound)
        assert out.shape == (B, C, H, W)
        assert jnp.allclose(out, ref, atol=1e-6), "mismatch vs reference"

    run_case(k_img0, 2, 3, 16, 16)   # lane dim = 256 (multiple of 128)
    run_case(k_img1, 2, 3, 8, 20)    # lane dim = 160 (full-dim block, not x128)

    # TODO(synk): Trigger.clamp()/set_target_name() are training-time utilities,
    # not part of forward(); not implemented here.
    print("KERNEL_OK")
</pallas_src>

<mosaic_0001>
module attributes {stable_mosaic.version = 11 : i64} {
  func.func @_trigger_kernel(%arg0: i32, %arg1: i32, %arg2: memref<1x3x256xf32, #tpu.memory_space<vmem>>, %arg3: memref<3x256xf32, #tpu.memory_space<vmem>>, %arg4: memref<3x1xf32, #tpu.memory_space<vmem>>, %arg5: memref<3x1xf32, #tpu.memory_space<vmem>>, %arg6: memref<1x3x256xf32, #tpu.memory_space<vmem>>) attributes {dimension_semantics = [#tpu.dimension_semantics<parallel>, #tpu.dimension_semantics<parallel>], iteration_bounds = array<i64: 1, 2>, scalar_prefetch = 0 : i64, scratch_operands = 0 : i64, tpu.core_type = #tpu.core_type<tc>, window_params = [{transform_indices = @transform_0, window_bounds = array<i64: 1, 3, 256>}, {transform_indices = @transform_1, window_bounds = array<i64: 3, 256>}, {pipeline_mode = #tpu.pipeline_mode<synchronous>, transform_indices = @transform_2, window_bounds = array<i64: 3, 1>}, {pipeline_mode = #tpu.pipeline_mode<synchronous>, transform_indices = @transform_3, window_bounds = array<i64: 3, 1>}, {transform_indices = @transform_4, window_bounds = array<i64: 1, 3, 256>}]} {
    %c0 = arith.constant 0 : index
    %c0_0 = arith.constant 0 : index
    %c0_1 = arith.constant 0 : index
    %0 = vector.load %arg2[%c0, %c0_0, %c0_1] : memref<1x3x256xf32, #tpu.memory_space<vmem>>, vector<1x3x256xf32>
    %1 = vector.shape_cast %0 : vector<1x3x256xf32> to vector<3x256xf32>
    %c0_2 = arith.constant 0 : index
    %c0_3 = arith.constant 0 : index
    %2 = vector.load %arg3[%c0_2, %c0_3] : memref<3x256xf32, #tpu.memory_space<vmem>>, vector<3x256xf32>
    %3 = arith.addf %1, %2 : vector<3x256xf32>
    %c0_4 = arith.constant 0 : index
    %c0_5 = arith.constant 0 : index
    %4 = vector.load %arg4[%c0_4, %c0_5] : memref<3x1xf32, #tpu.memory_space<vmem>>, vector<3x1xf32>
    %5 = vector.broadcast %4 : vector<3x1xf32> to vector<3x256xf32>
    %6 = arith.maximumf %3, %5 : vector<3x256xf32>
    %c0_6 = arith.constant 0 : index
    %c0_7 = arith.constant 0 : index
    %7 = vector.load %arg5[%c0_6, %c0_7] : memref<3x1xf32, #tpu.memory_space<vmem>>, vector<3x1xf32>
    %8 = vector.broadcast %7 : vector<3x1xf32> to vector<3x256xf32>
    %9 = arith.minimumf %6, %8 : vector<3x256xf32>
    %c0_8 = arith.constant 0 : index
    %c0_9 = arith.constant 0 : index
    %c0_10 = arith.constant 0 : index
    %10 = vector.load %arg6[%c0_8, %c0_9, %c0_10] : memref<1x3x256xf32, #tpu.memory_space<vmem>>, vector<1x3x256xf32>
    %11 = vector.shape_cast %10 : vector<1x3x256xf32> to vector<3x256xf32>
    %12 = vector.shape_cast %9 : vector<3x256xf32> to vector<1x3x256xf32>
    tpu.vector_store %arg6[%c0_8, %c0_9, %c0_10], %12 {strides = array<i32>} : memref<1x3x256xf32, #tpu.memory_space<vmem>>, vector<1x3x256xf32>,
    return
  }
  func.func @transform_0(%arg0: i32, %arg1: i32) -> (i32, i32, i32) {
    %c0_i32 = arith.constant 0 : i32
    %c0_i32_0 = arith.constant 0 : i32
    return %arg1, %c0_i32, %arg0 : i32, i32, i32
  }
  func.func @transform_1(%arg0: i32, %arg1: i32) -> (i32, i32) {
    %c0_i32 = arith.constant 0 : i32
    %c0_i32_0 = arith.constant 0 : i32
    return %c0_i32, %arg0 : i32, i32
  }
  func.func @transform_2(%arg0: i32, %arg1: i32) -> (i32, i32) {
    %c0_i32 = arith.constant 0 : i32
    %c0_i32_0 = arith.constant 0 : i32
    %c0_i32_1 = arith.constant 0 : i32
    return %c0_i32, %c0_i32_0 : i32, i32
  }
  func.func @transform_3(%arg0: i32, %arg1: i32) -> (i32, i32) {
    %c0_i32 = arith.constant 0 : i32
    %c0_i32_0 = arith.constant 0 : i32
    %c0_i32_1 = arith.constant 0 : i32
    return %c0_i32, %c0_i32_0 : i32, i32
  }
  func.func @transform_4(%arg0: i32, %arg1: i32) -> (i32, i32, i32) {
    %c0_i32 = arith.constant 0 : i32
    %c0_i32_0 = arith.constant 0 : i32
    return %arg1, %c0_i32, %arg0 : i32, i32, i32
  }
}

</mosaic_0001>

<bundles_post_ra>
// kernel: tpu_custom_call.1
= control target key start
LH: loop header
LB: loop body
LE: loop exit
PB: predicated region body
PF: predicated region fallthrough
CT: control target
= control target key end

     0   :  { %s485_s15 = smov 0   ;;  %s487_s16 = smov 0   ;;  %s527_s0 = inlined_call_operand.vmem [shape: f32[2,3,256], index: 0, kind: input, shape index: {}]   ;;  %s528_s1 = inlined_call_operand.vmem [shape: f32[3,256], index: 1, kind: input, shape index: {}]   ;;  %s529_s2 = inlined_call_operand.vmem [shape: f32[3,1], index: 2, kind: input, shape index: {}]   ;;  %s530_s3 = inlined_call_operand.vmem [shape: f32[3,1], index: 3, kind: input, shape index: {}]   ;;  %s531_s4 = inlined_call_operand.vmem [shape: f32[2,3,256], index: 4, kind: output, shape index: {}]  }
   0x1   :  { %s489_s17 = smov 0  }
   0x2 LB: > { %s23_s18 = sadd.s32 1, %s452_s16  ;;  %p398_p0 = scmp.ge.s32.totalorder %s456_s17, 1  ;;  %s456_s17 = sphi %s489_s17, %s14_s17   ;;  %s452_s16 = sphi %s487_s16, %s533_s16   ;;  %s448_s15 = sphi %s485_s15, %s532_s15  }
   0x3   : > { %p24_p1 = scmp.ge.s32.totalorder %s23_s18, 2  ;;  %p194_p2 = scmp.lt.s32.totalorder %s456_s17, 3 }
   0x5   : > { %s535_s18 = smov (%p24_p1, %s23_s18), 0  ;;  %p195_p3 = pnand %p398_p0, %p194_p2 }
   0x6   : > { %v262_v0 = vld [vmem:[%s529_s2] sm:$0x7] (!%p195_p3)  ;;  %v458_v1 = vmov (!%p195_p3), 0   ;;  %p234_p4 = scmp.lt.s32.totalorder (!%p195_p3), %s448_s15, 1  ;;  %v459_v3 = vmov (!%p195_p3), 839922192   ;;  %v270_v5 = vlaneseq (!%p195_p3) }
   0x7   : > { %198 = sbr.rel (%p195_p3) target bundleno = 145 (0x91), region = 36  ;;  %433 = vset.pattern.permute.xlu0 (!%p195_p3), %v458_v1  ;;  %v276_v2 = vld [vmem:[%s530_s3] sm:$0x7] (!%p195_p3)  ;;  %v268_v4 = vunpack.c.l.s4 (!%p195_p3), %v459_v3 }
   0x8   : > { %265 = vperm.xlu0 (!%p195_p3), %433, %v262_v0   ;;  %v271_v7 = vshrl.u32 (!%p195_p3), %v270_v5, 7  ;;  %v260_v10 = vld [vmem:[%s528_s1] sm:$0x77] (!%p195_p3) }
   0x9   : > { %v269_v6 = vunpack.c.0.s8 (!%p195_p3), %v268_v4 }
   0xb   : > { %v272_v8 = vsub.s32 (!%p195_p3), %v269_v6, %v271_v7 }
   0xc   : > { %279 = vperm.xlu0 (!%p195_p3), %433, %v276_v2  }
   0xe   : > { %s537_s15 = smov (!%p234_p4, %s448_s15), 1 }
   0xf   : > { %s405_s23 = sshll.u32 %s537_s15, 3 }
  0x10   : > { %s241_s26 = scalar_lea.vmem %s527_s0, %s405_s23  ;;  %s257_s5 = scalar_lea.vmem %s531_s4, %s405_s23 }
  0x11   : > { %v259_v9 = vld [vmem:[%s241_s26] sm:$0x77] }
  0x12   : > { %v261_v12 = vadd.f32 %v260_v10, %v259_v9 }
  0x87   : > { %v266_v11 = vpop.permute.xlu0 %265 }
  0x88   : > { %v273_v13 = vrot.slane %v266_v11, %v272_v8 }
  0x8a   : > { %v275_v15 = vmax.f32 %v261_v12, %v273_v13 }
  0x8b   : > { %v280_v14 = vpop.permute.xlu0 %279 }
  0x8c   : > { %v287_v16 = vrot.slane %v280_v14, %v272_v8 }
  0x8e   : > { %v289_v17 = vmin.f32 %v275_v15, %v287_v16 }
  0x90   : > { %290 = vst [vmem:[%s257_s5] sm:$0x77] %v289_v17 }
  0x91 PF: > { %s14_s17 = sadd.s32 1, %s456_s17   ;;  %s532_s15 = smov %s452_s16 }
  0x92   : > { %p11_p5 = scmp.ge.s32.totalorder %s14_s17, 4   ;;  %s533_s16 = smov %s535_s18 }
  0x94   :  { %13 = sbr.rel (!%p11_p5) target bundleno = 2 (0x2), region = 69 }

</bundles_post_ra>
